<compile_context>
chip_gen: v5e
topology: v5e:2x2
jax: 0.10.0
libtpu: 0.0.40
codegen_flags: <defaults>
</compile_context>

<pallas_src>
import jax
import jax.numpy as jnp
from jax.experimental import pallas as pl
from jax.experimental.pallas import tpu as pltpu


def _linear_kernel(x_ref, w_ref, xw_ref):
    # X: (N, Din), W: (Dout_pad, Din).  Contract the last dim of both (== X @ W.T)
    # so no transpose is materialized inside the kernel.
    xw = jax.lax.dot_general(
        x_ref[...],
        w_ref[...],
        dimension_numbers=(((1,), (1,)), ((), ())),
        preferred_element_type=jnp.float32,
    )
    xw_ref[...] = xw.astype(xw_ref.dtype)


def _aggregate_kernel(a_ref, xw_ref, o_ref):
    # tanh(A_stripe @ XW): bf16 operands, f32 accumulation, tanh in f32.
    out = jnp.dot(a_ref[...], xw_ref[...], preferred_element_type=jnp.float32)
    o_ref[...] = jnp.tanh(out).astype(o_ref.dtype)


def gcn_forward(a_hat, x, w, *, row_tile=256):
    """Pallas GCN layer: tanh(A_hat @ (x @ W.T)).

    a_hat: (N, N), x: (N, input_dim), w: (output_dim, input_dim)  -> (N, output_dim) f32
    """
    n, in_dim = x.shape
    out_dim = w.shape[0]

    # Pad output feature dim up to a multiple of 128 lanes (zero weights -> zero cols).
    out_pad = ((out_dim + 127) // 128) * 128

    a_bf = a_hat.astype(jnp.bfloat16)
    x_bf = x.astype(jnp.bfloat16)
    w_bf = w.astype(jnp.bfloat16)
    if out_pad != out_dim:
        w_bf = jnp.pad(w_bf, ((0, out_pad - out_dim), (0, 0)))

    # --- 1) Prologue: XW = X @ W.T, computed once, whole arrays in VMEM (no grid). ---
    xw = pl.pallas_call(
        _linear_kernel,
        out_shape=jax.ShapeDtypeStruct((n, out_pad), jnp.bfloat16),
        in_specs=[
            pl.BlockSpec(memory_space=pltpu.MemorySpace.VMEM),
            pl.BlockSpec(memory_space=pltpu.MemorySpace.VMEM),
        ],
        out_specs=pl.BlockSpec(memory_space=pltpu.MemorySpace.VMEM),
    )(x_bf, w_bf)

    # --- 2) Main: row-tiled tanh(A_hat @ XW), A stripes pipelined, XW resident. ---
    tm = min(row_tile, n)
    grid = (pl.cdiv(n, tm),)
    out_padded = pl.pallas_call(
        _aggregate_kernel,
        out_shape=jax.ShapeDtypeStruct((n, out_pad), jnp.float32),
        grid=grid,
        in_specs=[
            pl.BlockSpec((tm, n), lambda i: (i, 0)),        # A_hat row stripe (pipelined)
            pl.BlockSpec((n, out_pad), lambda i: (0, 0)),   # XW resident across row tiles
        ],
        out_specs=pl.BlockSpec((tm, out_pad), lambda i: (i, 0)),
        compiler_params=pltpu.CompilerParams(
            dimension_semantics=("parallel",),              # both TCs on v7x
        ),
    )(a_bf, xw)

    return out_padded[:, :out_dim]


if __name__ == "__main__":
    N = 256          # number of graph nodes
    INPUT_DIM = 64
    OUTPUT_DIM = 32

    key = jax.random.PRNGKey(0)
    k_a, k_x, k_w = jax.random.split(key, 3)

    # Symmetric normalized-ish adjacency (deterministic, synthetic)
    a_raw = jax.random.uniform(k_a, (N, N), dtype=jnp.float32)
    a_hat = (a_raw + a_raw.T) / (2.0 * N)

    x = jax.random.normal(k_x, (N, INPUT_DIM), dtype=jnp.float32)

    # Deterministic xavier-like init with tanh gain (mirrors init_weight(..., 'tanh'))
    gain = 5.0 / 3.0
    limit = gain * jnp.sqrt(6.0 / (INPUT_DIM + OUTPUT_DIM))
    w = jax.random.uniform(
        k_w, (OUTPUT_DIM, INPUT_DIM), dtype=jnp.float32, minval=-limit, maxval=limit
    )

    gcn = jax.jit(gcn_forward, static_argnames=("row_tile",))
    out = gcn(a_hat, x, w, row_tile=128)   # grid of 2 row tiles at N=256
    out = jax.block_until_ready(out)

    # Pure-JAX f32 reference; bf16 operands => relaxed tolerance.
    ref = jnp.tanh(a_hat @ (x @ w.T))
    assert out.shape == (N, OUTPUT_DIM)
    assert jnp.allclose(out, ref, atol=2e-2, rtol=2e-2), "mismatch vs reference"

    print("KERNEL_OK")
</pallas_src>

<mosaic_0001>
module attributes {stable_mosaic.version = 11 : i64} {
  func.func @_linear_kernel(%arg0: memref<256x64xbf16, #tpu.memory_space<vmem>>, %arg1: memref<128x64xbf16, #tpu.memory_space<vmem>>, %arg2: memref<256x128xbf16, #tpu.memory_space<vmem>>) attributes {dimension_semantics = [], scalar_prefetch = 0 : i64, scratch_operands = 0 : i64, tpu.core_type = #tpu.core_type<tc>} {
    %c0 = arith.constant 0 : index
    %c0_0 = arith.constant 0 : index
    %0 = vector.load %arg0[%c0, %c0_0] : memref<256x64xbf16, #tpu.memory_space<vmem>>, vector<256x64xbf16>
    %c0_1 = arith.constant 0 : index
    %c0_2 = arith.constant 0 : index
    %1 = vector.load %arg1[%c0_1, %c0_2] : memref<128x64xbf16, #tpu.memory_space<vmem>>, vector<128x64xbf16>
    %cst = arith.constant dense<0.000000e+00> : vector<256x128xf32>
    %2 = tpu.matmul %0, %1, %cst {dimension_numbers = #tpu.dot_dimension_numbers<[1], [1], [0], [0], [0, 0, 1, 0], [], []>} : vector<256x64xbf16>, vector<128x64xbf16>, vector<256x128xf32> -> vector<256x128xf32>
    %3 = arith.truncf %2 : vector<256x128xf32> to vector<256x128xbf16>
    %c0_3 = arith.constant 0 : index
    %c0_4 = arith.constant 0 : index
    %4 = vector.load %arg2[%c0_3, %c0_4] : memref<256x128xbf16, #tpu.memory_space<vmem>>, vector<256x128xbf16>
    tpu.vector_store %arg2[%c0_3, %c0_4], %3 {strides = array<i32>} : memref<256x128xbf16, #tpu.memory_space<vmem>>, vector<256x128xbf16>,
    return
  }
}

module attributes {stable_mosaic.version = 11 : i64} {
  func.func @_aggregate_kernel(%arg0: i32, %arg1: memref<128x256xbf16, #tpu.memory_space<vmem>>, %arg2: memref<256x128xbf16, #tpu.memory_space<vmem>>, %arg3: memref<128x128xf32, #tpu.memory_space<vmem>>) attributes {dimension_semantics = [#tpu.dimension_semantics<parallel>], iteration_bounds = array<i64: 2>, scalar_prefetch = 0 : i64, scratch_operands = 0 : i64, tpu.core_type = #tpu.core_type<tc>, window_params = [{transform_indices = @transform_0, window_bounds = array<i64: 128, 256>}, {pipeline_mode = #tpu.pipeline_mode<synchronous>, transform_indices = @transform_1, window_bounds = array<i64: 256, 128>}, {transform_indices = @transform_2, window_bounds = array<i64: 128, 128>}]} {
    %c0 = arith.constant 0 : index
    %c0_0 = arith.constant 0 : index
    %0 = vector.load %arg1[%c0, %c0_0] : memref<128x256xbf16, #tpu.memory_space<vmem>>, vector<128x256xbf16>
    %c0_1 = arith.constant 0 : index
    %c0_2 = arith.constant 0 : index
    %1 = vector.load %arg2[%c0_1, %c0_2] : memref<256x128xbf16, #tpu.memory_space<vmem>>, vector<256x128xbf16>
    %cst = arith.constant dense<0.000000e+00> : vector<128x128xf32>
    %2 = tpu.matmul %0, %1, %cst {dimension_numbers = #tpu.dot_dimension_numbers<[1], [0], [0], [1], [0, 0, 1, 1], [], []>} : vector<128x256xbf16>, vector<256x128xbf16>, vector<128x128xf32> -> vector<128x128xf32>
    %3 = math.tanh %2 : vector<128x128xf32>
    %c0_3 = arith.constant 0 : index
    %c0_4 = arith.constant 0 : index
    %4 = vector.load %arg3[%c0_3, %c0_4] : memref<128x128xf32, #tpu.memory_space<vmem>>, vector<128x128xf32>
    tpu.vector_store %arg3[%c0_3, %c0_4], %3 {strides = array<i32>} : memref<128x128xf32, #tpu.memory_space<vmem>>, vector<128x128xf32>,
    return
  }
  func.func @transform_0(%arg0: i32) -> (i32, i32) {
    %c0_i32 = arith.constant 0 : i32
    %c0_i32_0 = arith.constant 0 : i32
    return %arg0, %c0_i32 : i32, i32
  }
  func.func @transform_1(%arg0: i32) -> (i32, i32) {
    %c0_i32 = arith.constant 0 : i32
    %c0_i32_0 = arith.constant 0 : i32
    %c0_i32_1 = arith.constant 0 : i32
    return %c0_i32, %c0_i32_0 : i32, i32
  }
  func.func @transform_2(%arg0: i32) -> (i32, i32) {
    %c0_i32 = arith.constant 0 : i32
    %c0_i32_0 = arith.constant 0 : i32
    return %arg0, %c0_i32 : i32, i32
  }
}

</mosaic_0001>

<bundles_post_ra>
// kernel: gcn_forward.2
= control target key start
LH: loop header
LB: loop body
LE: loop exit
PB: predicated region body
PF: predicated region fallthrough
CT: control target
= control target key end

     0   :  { %vm179_vm0 = vcmask 523264   ;;  %s823_s1 = inlined_call_operand.vmem [shape: bf16[128,64], index: 1, kind: input, shape index: {}]   ;;  %s824_s0 = inlined_call_operand.vmem [shape: bf16[256,64], index: 0, kind: input, shape index: {}]   ;;  %s825_s2 = inlined_call_operand.vmem [shape: bf16[256,128], index: 2, kind: output, shape index: {}]  }
   0x1   :  { %v544_v0 = vld [vmem:[%s823_s1 + $0x38] sm:$0xff]  ;;  %v543_v2 = vld [vmem:[%s823_s1 + $0x30] sm:$0xff]  ;;  %v542_v4 = vld [vmem:[%s823_s1 + $0x28] sm:$0xff] }
   0x2   :  { %v250_v1 = vsel %vm179_vm0, %v544_v0, 0  ;;  %v247_v3 = vsel %vm179_vm0, %v543_v2, 0  ;;  %v244_v5 = vsel %vm179_vm0, %v542_v4, 0  ;;  %v541_v6 = vld [vmem:[%s823_s1 + $0x20] sm:$0xff]  ;;  %v540_v8 = vld [vmem:[%s823_s1 + $0x18] sm:$0xff]  ;;  %v539_v10 = vld [vmem:[%s823_s1 + $0x10] sm:$0xff] }
   0x3   :  { %252 = vmatpush.bf16.xpose.msra.mxu0 %v250_v1  ;;  %640 = vmatpush.bf16.xpose.msra.mxu1 %v250_v1  ;;  %v241_v7 = vsel %vm179_vm0, %v541_v6, 0  ;;  %v238_v9 = vsel %vm179_vm0, %v540_v8, 0  ;;  %v235_v11 = vsel %vm179_vm0, %v539_v10, 0  ;;  %v538_v12 = vld [vmem:[%s823_s1 + $0x8] sm:$0xff]  ;;  %v537_v14 = vld [vmem:[%s823_s1] sm:$0xff]  ;;  %v523_v24 = vld [vmem:[%s824_s0 + $0x10] sm:$0xff] }
   0x4   :  { %641 = vmatpush.bf16.xpose.msra.mxu2 %v250_v1  ;;  %642 = vmatpush.bf16.xpose.msra.mxu3 %v250_v1  ;;  %v232_v13 = vsel %vm179_vm0, %v538_v12, 0  ;;  %v229_v15 = vsel %vm179_vm0, %v537_v14, 0  ;;  %v521_v16 = vld [vmem:[%s824_s0] sm:$0xff]  ;;  %v522_v20 = vld [vmem:[%s824_s0 + $0x8] sm:$0xff]  ;;  %v527_v25 = vld [vmem:[%s824_s0 + $0x30] sm:$0xff] }
   0x5   :  { %v525_v17 = vld [vmem:[%s824_s0 + $0x20] sm:$0xff]  ;;  %v526_v21 = vld [vmem:[%s824_s0 + $0x28] sm:$0xff]  ;;  %v531_v26 = vld [vmem:[%s824_s0 + $0x50] sm:$0xff] }
   0x6   :  { %v529_v18 = vld [vmem:[%s824_s0 + $0x40] sm:$0xff]  ;;  %v530_v22 = vld [vmem:[%s824_s0 + $0x48] sm:$0xff]  ;;  %v535_v27 = vld [vmem:[%s824_s0 + $0x70] sm:$0xff] }
   0x7   :  { %v533_v19 = vld [vmem:[%s824_s0 + $0x60] sm:$0xff]  ;;  %v534_v23 = vld [vmem:[%s824_s0 + $0x68] sm:$0xff]  ;;  %v524_v28 = vld [vmem:[%s824_s0 + $0x18] sm:$0xff] }
   0x8   :  { %v528_v29 = vld [vmem:[%s824_s0 + $0x38] sm:$0xff] }
   0x9   :  { %v532_v30 = vld [vmem:[%s824_s0 + $0x58] sm:$0xff] }
   0xa   :  { %v536_v31 = vld [vmem:[%s824_s0 + $0x78] sm:$0xff] }
   0xb   :  { %253 = vmatpush.bf16.xpose.msra.mxu0 %v247_v3  ;;  %643 = vmatpush.bf16.xpose.msra.mxu1 %v247_v3 }
   0xc   :  { %644 = vmatpush.bf16.xpose.msra.mxu2 %v247_v3  ;;  %645 = vmatpush.bf16.xpose.msra.mxu3 %v247_v3 }
  0x13   :  { %254 = vmatpush.bf16.xpose.msra.mxu0 %v244_v5  ;;  %646 = vmatpush.bf16.xpose.msra.mxu1 %v244_v5 }
  0x14   :  { %647 = vmatpush.bf16.xpose.msra.mxu2 %v244_v5  ;;  %648 = vmatpush.bf16.xpose.msra.mxu3 %v244_v5 }
  0x1b   :  { %255 = vmatpush.bf16.xpose.msra.mxu0 %v241_v7  ;;  %649 = vmatpush.bf16.xpose.msra.mxu1 %v241_v7 }
  0x1c   :  { %650 = vmatpush.bf16.xpose.msra.mxu2 %v241_v7  ;;  %651 = vmatpush.bf16.xpose.msra.mxu3 %v241_v7 }
  0x23   :  { %256 = vmatpush.bf16.xpose.msra.mxu0 %v238_v9  ;;  %652 = vmatpush.bf16.xpose.msra.mxu1 %v238_v9 }
  0x24   :  { %653 = vmatpush.bf16.xpose.msra.mxu2 %v238_v9  ;;  %654 = vmatpush.bf16.xpose.msra.mxu3 %v238_v9 }
  0x2b   :  { %257 = vmatpush.bf16.xpose.msra.mxu0 %v235_v11  ;;  %655 = vmatpush.bf16.xpose.msra.mxu1 %v235_v11 }
  0x2c   :  { %656 = vmatpush.bf16.xpose.msra.mxu2 %v235_v11  ;;  %657 = vmatpush.bf16.xpose.msra.mxu3 %v235_v11 }
  0x33   :  { %258 = vmatpush.bf16.xpose.msra.mxu0 %v232_v13  ;;  %658 = vmatpush.bf16.xpose.msra.mxu1 %v232_v13 }
  0x34   :  { %659 = vmatpush.bf16.xpose.msra.mxu2 %v232_v13  ;;  %660 = vmatpush.bf16.xpose.msra.mxu3 %v232_v13 }
  0x3b   :  { %259 = vmatpush.bf16.xpose.msra.mxu0 %v229_v15  ;;  %661 = vmatpush.bf16.xpose.msra.mxu1 %v229_v15 }
  0x3c   :  { %662 = vmatpush.bf16.xpose.msra.mxu2 %v229_v15  ;;  %663 = vmatpush.bf16.xpose.msra.mxu3 %v229_v15 }
  0x42   :  { %505 = vmatmul.msk.bf16.vlgmr.msra.gmra.mxu0 %vm179_vm0, %v521_v16  ;;  %509 = vmatmul.msk.bf16.vlgmr.msra.gmra.mxu1 %vm179_vm0, %v525_v17 }
  0x43   :  { %513 = vmatmul.msk.bf16.vlgmr.msra.gmra.mxu2 %vm179_vm0, %v529_v18  ;;  %517 = vmatmul.msk.bf16.vlgmr.msra.gmra.mxu3 %vm179_vm0, %v533_v19 }
  0x52   :  { %506 = vmatmul.msk.bf16.gmra.mxu0 %vm179_vm0, %v522_v20  ;;  %510 = vmatmul.msk.bf16.gmra.mxu1 %vm179_vm0, %v526_v21 }
  0x53   :  { %514 = vmatmul.msk.bf16.gmra.mxu2 %vm179_vm0, %v530_v22  ;;  %518 = vmatmul.msk.bf16.gmra.mxu3 %vm179_vm0, %v534_v23 }
  0x62   :  { %507 = vmatmul.msk.bf16.gmra.mxu0 %vm179_vm0, %v523_v24  ;;  %511 = vmatmul.msk.bf16.gmra.mxu1 %vm179_vm0, %v527_v25 }
  0x63   :  { %515 = vmatmul.msk.bf16.gmra.mxu2 %vm179_vm0, %v531_v26  ;;  %519 = vmatmul.msk.bf16.gmra.mxu3 %vm179_vm0, %v535_v27 }
  0x72   :  { %508 = vmatmul.msk.bf16.gmra.mxu0 %vm179_vm0, %v524_v28  ;;  %512 = vmatmul.msk.bf16.gmra.mxu1 %vm179_vm0, %v528_v29 }
  0x73   :  { %516 = vmatmul.msk.bf16.gmra.mxu2 %vm179_vm0, %v532_v30  ;;  %520 = vmatmul.msk.bf16.gmra.mxu3 %vm179_vm0, %v536_v31 }
  0xbf   :  { %v261_v32 = vpop.f32.mrf.mxu0  ;;  %v281_v33 = vpop.f32.mrf.mxu1 }
  0xc6   :  { %v301_v34 = vpop.f32.mrf.mxu2  ;;  %v321_v35 = vpop.f32.mrf.mxu3 }
  0xc7   :  { %v263_v36 = vpop.f32.mrf.mxu0  ;;  %v283_v37 = vpop.f32.mrf.mxu1 }
  0xc8   :  { %v548_v38 = vpack.c.bf16 %v263_v36, %v261_v32  ;;  %v568_v39 = vpack.c.bf16 %v283_v37, %v281_v33 }
  0xca   :  { %549 = vst [vmem:[%s825_s2] sm:$0xff] %v548_v38  }
  0xcb   :  { %628 = vst [vmem:[%s825_s2 + $0x20] sm:$0xff] %v568_v39  }
  0xce   :  { %v303_v40 = vpop.f32.mrf.mxu2  ;;  %v323_v41 = vpop.f32.mrf.mxu3 }
  0xcf   :  { %v588_v42 = vpack.c.bf16 %v303_v40, %v301_v34  ;;  %v608_v43 = vpack.c.bf16 %v323_v41, %v321_v35  ;;  %v266_v44 = vpop.f32.mrf.mxu0  ;;  %v286_v45 = vpop.f32.mrf.mxu1 }
  0xd1   :  { %632 = vst [vmem:[%s825_s2 + $0x40] sm:$0xff] %v588_v42  }
  0xd2   :  { %636 = vst [vmem:[%s825_s2 + $0x60] sm:$0xff] %v608_v43  }
  0xd6   :  { %v306_v46 = vpop.f32.mrf.mxu2  ;;  %v326_v47 = vpop.f32.mrf.mxu3 }
  0xd7   :  { %v268_v48 = vpop.f32.mrf.mxu0  ;;  %v288_v49 = vpop.f32.mrf.mxu1 }
  0xd8   :  { %v553_v50 = vpack.c.bf16 %v268_v48, %v266_v44  ;;  %v573_v51 = vpack.c.bf16 %v288_v49, %v286_v45 }
  0xda   :  { %625 = vst [vmem:[%s825_s2 + $0x8] sm:$0xff] %v553_v50  }
  0xdb   :  { %629 = vst [vmem:[%s825_s2 + $0x28] sm:$0xff] %v573_v51  }
  0xde   :  { %v308_v52 = vpop.f32.mrf.mxu2  ;;  %v328_v53 = vpop.f32.mrf.mxu3 }
  0xdf   :  { %v593_v54 = vpack.c.bf16 %v308_v52, %v306_v46  ;;  %v613_v55 = vpack.c.bf16 %v328_v53, %v326_v47  ;;  %v271_v56 = vpop.f32.mrf.mxu0  ;;  %v291_v57 = vpop.f32.mrf.mxu1 }
  0xe1   :  { %633 = vst [vmem:[%s825_s2 + $0x48] sm:$0xff] %v593_v54  }
  0xe2   :  { %637 = vst [vmem:[%s825_s2 + $0x68] sm:$0xff] %v613_v55  }
  0xe6   :  { %v311_v58 = vpop.f32.mrf.mxu2  ;;  %v331_v59 = vpop.f32.mrf.mxu3 }
  0xe7   :  { %v273_v60 = vpop.f32.mrf.mxu0  ;;  %v293_v61 = vpop.f32.mrf.mxu1 }
  0xe8   :  { %v558_v62 = vpack.c.bf16 %v273_v60, %v271_v56  ;;  %v578_v63 = vpack.c.bf16 %v293_v61, %v291_v57 }
  0xea   :  { %626 = vst [vmem:[%s825_s2 + $0x10] sm:$0xff] %v558_v62  }
  0xeb   :  { %630 = vst [vmem:[%s825_s2 + $0x30] sm:$0xff] %v578_v63  }
  0xee   :  { %v313_v0 = vpop.f32.mrf.mxu2  ;;  %v333_v1 = vpop.f32.mrf.mxu3 }
  0xef   :  { %v598_v2 = vpack.c.bf16 %v313_v0, %v311_v58  ;;  %v618_v3 = vpack.c.bf16 %v333_v1, %v331_v59  ;;  %v276_v4 = vpop.f32.mrf.mxu0  ;;  %v296_v5 = vpop.f32.mrf.mxu1 }
  0xf1   :  { %634 = vst [vmem:[%s825_s2 + $0x50] sm:$0xff] %v598_v2  }
  0xf2   :  { %638 = vst [vmem:[%s825_s2 + $0x70] sm:$0xff] %v618_v3  }
  0xf6   :  { %v316_v6 = vpop.f32.mrf.mxu2  ;;  %v336_v7 = vpop.f32.mrf.mxu3 }
  0xf7   :  { %v278_v8 = vpop.f32.mrf.mxu0  ;;  %v298_v9 = vpop.f32.mrf.mxu1 }
  0xf8   :  { %v563_v10 = vpack.c.bf16 %v278_v8, %v276_v4  ;;  %v583_v11 = vpack.c.bf16 %v298_v9, %v296_v5 }
  0xfa   :  { %627 = vst [vmem:[%s825_s2 + $0x18] sm:$0xff] %v563_v10  }
  0xfb   :  { %631 = vst [vmem:[%s825_s2 + $0x38] sm:$0xff] %v583_v11  }
  0xfe   :  { %v318_v12 = vpop.f32.mrf.mxu2  ;;  %v338_v13 = vpop.f32.mrf.mxu3 }
  0xff   :  { %v603_v14 = vpack.c.bf16 %v318_v12, %v316_v6  ;;  %v623_v15 = vpack.c.bf16 %v338_v13, %v336_v7 }
 0x101   :  { %635 = vst [vmem:[%s825_s2 + $0x58] sm:$0xff] %v603_v14  }
 0x102   :  { %639 = vst [vmem:[%s825_s2 + $0x78] sm:$0xff] %v623_v15  }

// kernel: gcn_forward.3
= control target key start
LH: loop header
LB: loop body
LE: loop exit
PB: predicated region body
PF: predicated region fallthrough
CT: control target
= control target key end

     0   :  { %s812_s9 = smov 0   ;;  %s936_s0 = inlined_call_operand.vmem [shape: bf16[256,256], index: 0, kind: input, shape index: {}]   ;;  %s937_s1 = inlined_call_operand.vmem [shape: bf16[256,128], index: 1, kind: input, shape index: {}]   ;;  %s938_s2 = inlined_call_operand.vmem [shape: f32[256,128], index: 2, kind: output, shape index: {}]  }
   0x1 LB: > { %s560_s10 = sadd.s32 4294967295, %s795_s9   ;;  %p564_p0 = scmp.ge.s32.totalorder %s795_s9, 1  ;;  %s795_s9 = sphi %s812_s9, %s12_s9  }
   0x2   : > { %p114_p1 = scmp.lt.s32.totalorder %s795_s9, 3 }
   0x4   : > { %p115_p2 = pnand %p564_p0, %p114_p1 }
   0x5   : > { %s565_s23 = sshll.u32 (!%p115_p2), %s560_s10, 4 }
   0x6   : > { %118 = sbr.rel (%p115_p2) target bundleno = 242 (0xf2), region = 28  ;;  %p138_p3 = scmp.lt.s32.totalorder (!%p115_p2), %s565_s23, 31 }
   0xb   : > { %v724_v0 = vld [vmem:[%s937_s1 + $0x38] sm:$0xff]  ;;  %v723_v2 = vld [vmem:[%s937_s1 + $0x30] sm:$0xff]  ;;  %v722_v4 = vld [vmem:[%s937_s1 + $0x28] sm:$0xff]  ;;  %s940_s23 = smov (!%p138_p3, %s565_s23), 31 }
   0xc   : > { %v732_v1 = vld [vmem:[%s937_s1 + $0x78] sm:$0xff]  ;;  %374 = vmatpush.bf16.msra.mxu0 %v724_v0  ;;  %733 = vmatpush.bf16.msra.mxu2 %v724_v0  ;;  %v731_v3 = vld [vmem:[%s937_s1 + $0x70] sm:$0xff]  ;;  %v730_v5 = vld [vmem:[%s937_s1 + $0x68] sm:$0xff]  ;;  %s700_s8 = sshll.u32 %s940_s23, 3 }
   0xd   : > { %423 = vmatpush.bf16.msra.mxu1 %v732_v1  ;;  %741 = vmatpush.bf16.msra.mxu3 %v732_v1  ;;  %v721_v6 = vld [vmem:[%s937_s1 + $0x20] sm:$0xff]  ;;  %v720_v8 = vld [vmem:[%s937_s1 + $0x18] sm:$0xff]  ;;  %v719_v10 = vld [vmem:[%s937_s1 + $0x10] sm:$0xff]  ;;  %s867_s14 = scalar_lea.vmem %s936_s0, %s700_s8  ;;  %s915_s24 = scalar_lea.vmem %s938_s2, %s700_s8 }
   0xe   : > { %v729_v7 = vld [vmem:[%s937_s1 + $0x60] sm:$0xff]  ;;  %v728_v9 = vld [vmem:[%s937_s1 + $0x58] sm:$0xff]  ;;  %v727_v11 = vld [vmem:[%s937_s1 + $0x50] sm:$0xff] }
   0xf   : > { %v718_v12 = vld [vmem:[%s937_s1 + $0x8] sm:$0xff]  ;;  %v717_v14 = vld [vmem:[%s937_s1] sm:$0xff]  ;;  %v580_v28 = vld [vmem:[%s867_s14 + $0x10] sm:$0xf] }
  0x10   : > { %375 = vmatpush.bf16.msra.mxu0 %v723_v2  ;;  %734 = vmatpush.bf16.msra.mxu2 %v723_v2  ;;  %v726_v13 = vld [vmem:[%s937_s1 + $0x48] sm:$0xff]  ;;  %v725_v15 = vld [vmem:[%s937_s1 + $0x40] sm:$0xff]  ;;  %v704_v29 = vld [vmem:[%s867_s14 + $0x14] sm:$0xf0] }
  0x11   : > { %424 = vmatpush.bf16.msra.mxu1 %v731_v3  ;;  %742 = vmatpush.bf16.msra.mxu3 %v731_v3  ;;  %v572_v16 = vld [vmem:[%s867_s14] sm:$0xf]  ;;  %v702_v17 = vld [vmem:[%s867_s14 + $0x4] sm:$0xf0]  ;;  %v701_v20 = vld [vmem:[%s867_s14 + $0x4] sm:$0xf]  ;;  %v581_v36 = vor.u32 %v704_v29, %v580_v28 }
  0x12   : > { %v604_v18 = vld [vmem:[%s867_s14 + $0x40] sm:$0xf]  ;;  %v710_v19 = vld [vmem:[%s867_s14 + $0x44] sm:$0xf0]  ;;  %v574_v21 = vld [vmem:[%s867_s14 + $0x8] sm:$0xf0]  ;;  %v573_v24 = vor.u32 %v702_v17, %v572_v16 }
  0x13   : > { %v709_v22 = vld [vmem:[%s867_s14 + $0x44] sm:$0xf]  ;;  %v606_v23 = vld [vmem:[%s867_s14 + $0x48] sm:$0xf0]  ;;  %v605_v25 = vor.u32 %v710_v19, %v604_v18  ;;  %v577_v26 = vor.u32 %v701_v20, %v574_v21  ;;  %v612_v30 = vld [vmem:[%s867_s14 + $0x50] sm:$0xf] }
  0x14   : > { %376 = vmatpush.bf16.msra.mxu0 %v722_v4  ;;  %735 = vmatpush.bf16.msra.mxu2 %v722_v4  ;;  %v609_v27 = vor.u32 %v709_v22, %v606_v23  ;;  %v712_v31 = vld [vmem:[%s867_s14 + $0x54] sm:$0xf0]  ;;  %v703_v32 = vld [vmem:[%s867_s14 + $0x14] sm:$0xf]  ;;  %v582_v33 = vld [vmem:[%s867_s14 + $0x18] sm:$0xf0] }
  0x15   : > { %425 = vmatpush.bf16.msra.mxu1 %v730_v5  ;;  %743 = vmatpush.bf16.msra.mxu3 %v730_v5  ;;  %v711_v34 = vld [vmem:[%s867_s14 + $0x54] sm:$0xf]  ;;  %v614_v35 = vld [vmem:[%s867_s14 + $0x58] sm:$0xf0]  ;;  %v613_v37 = vor.u32 %v712_v31, %v612_v30  ;;  %v585_v38 = vor.u32 %v703_v32, %v582_v33  ;;  %v588_v40 = vld [vmem:[%s867_s14 + $0x20] sm:$0xf] }
  0x16   : > { %v617_v39 = vor.u32 %v711_v34, %v614_v35  ;;  %v706_v41 = vld [vmem:[%s867_s14 + $0x24] sm:$0xf0]  ;;  %v620_v42 = vld [vmem:[%s867_s14 + $0x60] sm:$0xf]  ;;  %v705_v44 = vld [vmem:[%s867_s14 + $0x24] sm:$0xf] }
  0x17   : > { %v714_v43 = vld [vmem:[%s867_s14 + $0x64] sm:$0xf0]  ;;  %v590_v45 = vld [vmem:[%s867_s14 + $0x28] sm:$0xf0]  ;;  %v713_v46 = vld [vmem:[%s867_s14 + $0x64] sm:$0xf]  ;;  %v589_v48 = vor.u32 %v706_v41, %v588_v40 }
  0x18   : > { %377 = vmatpush.bf16.msra.mxu0 %v721_v6  ;;  %736 = vmatpush.bf16.msra.mxu2 %v721_v6  ;;  %v622_v47 = vld [vmem:[%s867_s14 + $0x68] sm:$0xf0]  ;;  %v621_v49 = vor.u32 %v714_v43, %v620_v42  ;;  %v593_v50 = vor.u32 %v705_v44, %v590_v45  ;;  %v596_v52 = vld [vmem:[%s867_s14 + $0x30] sm:$0xf]  ;;  %v708_v53 = vld [vmem:[%s867_s14 + $0x34] sm:$0xf0] }
  0x19   : > { %426 = vmatpush.bf16.msra.mxu1 %v729_v7  ;;  %744 = vmatpush.bf16.msra.mxu3 %v729_v7  ;;  %v625_v51 = vor.u32 %v713_v46, %v622_v47  ;;  %v628_v54 = vld [vmem:[%s867_s14 + $0x70] sm:$0xf]  ;;  %v716_v55 = vld [vmem:[%s867_s14 + $0x74] sm:$0xf0]  ;;  %v707_v56 = vld [vmem:[%s867_s14 + $0x34] sm:$0xf]  ;;  %v597_v60 = vor.u32 %v708_v53, %v596_v52 }
  0x1a   : > { %v598_v57 = vld [vmem:[%s867_s14 + $0x38] sm:$0xf0]  ;;  %v715_v58 = vld [vmem:[%s867_s14 + $0x74] sm:$0xf]  ;;  %v629_v61 = vor.u32 %v716_v55, %v628_v54 }
  0x1b   : > { %v630_v59 = vld [vmem:[%s867_s14 + $0x78] sm:$0xf0]  ;;  %v601_v62 = vor.u32 %v707_v56, %v598_v57 }
  0x1c   : > { %378 = vmatpush.bf16.msra.mxu0 %v720_v8  ;;  %737 = vmatpush.bf16.msra.mxu2 %v720_v8  ;;  %v633_v63 = vor.u32 %v715_v58, %v630_v59 }
  0x1d   : > { %427 = vmatpush.bf16.msra.mxu1 %v728_v9  ;;  %745 = vmatpush.bf16.msra.mxu3 %v728_v9 }
  0x20   : > { %379 = vmatpush.bf16.msra.mxu0 %v719_v10  ;;  %738 = vmatpush.bf16.msra.mxu2 %v719_v10 }
  0x21   : > { %428 = vmatpush.bf16.msra.mxu1 %v727_v11  ;;  %746 = vmatpush.bf16.msra.mxu3 %v727_v11 }
  0x24   : > { %380 = vmatpush.bf16.msra.mxu0 %v718_v12  ;;  %739 = vmatpush.bf16.msra.mxu2 %v718_v12 }
  0x25   : > { %429 = vmatpush.bf16.msra.mxu1 %v726_v13  ;;  %747 = vmatpush.bf16.msra.mxu3 %v726_v13 }
  0x28   : > { %381 = vmatpush.bf16.msra.mxu0 %v717_v14  ;;  %740 = vmatpush.bf16.msra.mxu2 %v717_v14 }
  0x29   : > { %430 = vmatpush.bf16.msra.mxu1 %v725_v15  ;;  %748 = vmatpush.bf16.msra.mxu3 %v725_v15 }
  0x2b   : > { %382 = vmatmul.bf16.vlgmr.msra.gmra.mxu0 %v573_v24  ;;  %402 = vmatmul.bf16.vlgmr.msra.gmra.mxu2 %v605_v25 }
  0x2c   : > { %431 = vmatmul.bf16.vlgmr.msra.gmra.mxu1 %v577_v26  ;;  %451 = vmatmul.bf16.vlgmr.msra.gmra.mxu3 %v609_v27 }
  0x3b   : > { %387 = vmatmul.bf16.gmra.mxu0 %v581_v36  ;;  %407 = vmatmul.bf16.gmra.mxu2 %v613_v37 }
  0x3c   : > { %436 = vmatmul.bf16.gmra.mxu1 %v585_v38  ;;  %456 = vmatmul.bf16.gmra.mxu3 %v617_v39 }
  0x4b   : > { %392 = vmatmul.bf16.gmra.mxu0 %v589_v48  ;;  %412 = vmatmul.bf16.gmra.mxu2 %v621_v49 }
  0x4c   : > { %441 = vmatmul.bf16.gmra.mxu1 %v593_v50  ;;  %461 = vmatmul.bf16.gmra.mxu3 %v625_v51 }
  0x5b   : > { %397 = vmatmul.bf16.gmra.mxu0 %v597_v60  ;;  %417 = vmatmul.bf16.gmra.mxu2 %v629_v61 }
  0x5c   : > { %446 = vmatmul.bf16.gmra.mxu1 %v601_v62  ;;  %466 = vmatmul.bf16.gmra.mxu3 %v633_v63 }
  0xa8   : > { %v383_v0 = vpop.f32.mrf.mxu0 }
  0xa9   : > { %v432_v1 = vpop.f32.mrf.mxu1 }
  0xaa   : > { %v433_v2 = vadd.f32 %v432_v1, %v383_v0 }
  0xac   : > { %757 = vtanh.f32 %v433_v2 }
  0xae   : > { %v403_v3 = vpop.f32.mrf.mxu2 }
  0xaf   : > { %v452_v4 = vpop.f32.mrf.mxu3 }
  0xb0   : > { %v453_v5 = vadd.f32 %v452_v4, %v403_v3  ;;  %v385_v6 = vpop.f32.mrf.mxu0 }
  0xb1   : > { %v434_v7 = vpop.f32.mrf.mxu1 }
  0xb2   : > { %v758_v8 = vpop.eup %757  ;;  %759 = vtanh.f32 %v453_v5  ;;  %v435_v9 = vadd.f32 %v434_v7, %v385_v6 }
  0xb3   : > { %488 = vst [vmem:[%s915_s24] sm:$0xff] %v758_v8 }
  0xb4   : > { %761 = vtanh.f32 %v435_v9 }
  0xb6   : > { %v405_v10 = vpop.f32.mrf.mxu2 }
  0xb7   : > { %v454_v11 = vpop.f32.mrf.mxu3 }
  0xb8   : > { %v760_v12 = vpop.eup %759  ;;  %v455_v13 = vadd.f32 %v454_v11, %v405_v10  ;;  %v388_v14 = vpop.f32.mrf.mxu0 }
  0xb9   : > { %496 = vst [vmem:[%s915_s24 + $0x40] sm:$0xff] %v760_v12  ;;  %v437_v15 = vpop.f32.mrf.mxu1 }
  0xba   : > { %v762_v16 = vpop.eup %761  ;;  %763 = vtanh.f32 %v455_v13  ;;  %v438_v17 = vadd.f32 %v437_v15, %v388_v14 }
  0xbb   : > { %489 = vst [vmem:[%s915_s24 + $0x8] sm:$0xff] %v762_v16 }
  0xbc   : > { %765 = vtanh.f32 %v438_v17 }
  0xbe   : > { %v408_v18 = vpop.f32.mrf.mxu2 }
  0xbf   : > { %v457_v19 = vpop.f32.mrf.mxu3 }
  0xc0   : > { %v764_v20 = vpop.eup %763  ;;  %v458_v21 = vadd.f32 %v457_v19, %v408_v18  ;;  %v390_v22 = vpop.f32.mrf.mxu0 }
  0xc1   : > { %497 = vst [vmem:[%s915_s24 + $0x48] sm:$0xff] %v764_v20  ;;  %v439_v23 = vpop.f32.mrf.mxu1 }
  0xc2   : > { %v766_v24 = vpop.eup %765  ;;  %767 = vtanh.f32 %v458_v21  ;;  %v440_v25 = vadd.f32 %v439_v23, %v390_v22 }
  0xc3   : > { %490 = vst [vmem:[%s915_s24 + $0x10] sm:$0xff] %v766_v24 }
  0xc4   : > { %769 = vtanh.f32 %v440_v25 }
  0xc6   : > { %v410_v26 = vpop.f32.mrf.mxu2 }
  0xc7   : > { %v459_v27 = vpop.f32.mrf.mxu3 }
  0xc8   : > { %v768_v28 = vpop.eup %767  ;;  %v460_v29 = vadd.f32 %v459_v27, %v410_v26  ;;  %v393_v30 = vpop.f32.mrf.mxu0 }
  0xc9   : > { %498 = vst [vmem:[%s915_s24 + $0x50] sm:$0xff] %v768_v28  ;;  %v442_v31 = vpop.f32.mrf.mxu1 }
  0xca   : > { %v770_v32 = vpop.eup %769  ;;  %771 = vtanh.f32 %v460_v29  ;;  %v443_v33 = vadd.f32 %v442_v31, %v393_v30 }
  0xcb   : > { %491 = vst [vmem:[%s915_s24 + $0x18] sm:$0xff] %v770_v32 }
  0xcc   : > { %773 = vtanh.f32 %v443_v33 }
  0xce   : > { %v413_v34 = vpop.f32.mrf.mxu2 }
  0xcf   : > { %v462_v35 = vpop.f32.mrf.mxu3 }
  0xd0   : > { %v772_v36 = vpop.eup %771  ;;  %v463_v37 = vadd.f32 %v462_v35, %v413_v34  ;;  %v395_v38 = vpop.f32.mrf.mxu0 }
  0xd1   : > { %499 = vst [vmem:[%s915_s24 + $0x58] sm:$0xff] %v772_v36  ;;  %v444_v39 = vpop.f32.mrf.mxu1 }
  0xd2   : > { %v774_v40 = vpop.eup %773  ;;  %775 = vtanh.f32 %v463_v37  ;;  %v445_v41 = vadd.f32 %v444_v39, %v395_v38 }
  0xd3   : > { %492 = vst [vmem:[%s915_s24 + $0x20] sm:$0xff] %v774_v40 }
  0xd4   : > { %777 = vtanh.f32 %v445_v41 }
  0xd6   : > { %v415_v42 = vpop.f32.mrf.mxu2 }
  0xd7   : > { %v464_v43 = vpop.f32.mrf.mxu3 }
  0xd8   : > { %v776_v44 = vpop.eup %775  ;;  %v465_v45 = vadd.f32 %v464_v43, %v415_v42  ;;  %v398_v46 = vpop.f32.mrf.mxu0 }
  0xd9   : > { %500 = vst [vmem:[%s915_s24 + $0x60] sm:$0xff] %v776_v44  ;;  %v447_v47 = vpop.f32.mrf.mxu1 }
  0xda   : > { %v778_v48 = vpop.eup %777  ;;  %779 = vtanh.f32 %v465_v45  ;;  %v448_v49 = vadd.f32 %v447_v47, %v398_v46 }
  0xdb   : > { %493 = vst [vmem:[%s915_s24 + $0x28] sm:$0xff] %v778_v48 }
  0xdc   : > { %781 = vtanh.f32 %v448_v49 }
  0xde   : > { %v418_v50 = vpop.f32.mrf.mxu2 }
  0xdf   : > { %v467_v51 = vpop.f32.mrf.mxu3 }
  0xe0   : > { %v780_v52 = vpop.eup %779  ;;  %v468_v53 = vadd.f32 %v467_v51, %v418_v50  ;;  %v400_v54 = vpop.f32.mrf.mxu0 }
  0xe1   : > { %501 = vst [vmem:[%s915_s24 + $0x68] sm:$0xff] %v780_v52  ;;  %v449_v55 = vpop.f32.mrf.mxu1 }
  0xe2   : > { %v782_v56 = vpop.eup %781  ;;  %783 = vtanh.f32 %v468_v53  ;;  %v450_v57 = vadd.f32 %v449_v55, %v400_v54 }
  0xe3   : > { %494 = vst [vmem:[%s915_s24 + $0x30] sm:$0xff] %v782_v56 }
  0xe4   : > { %785 = vtanh.f32 %v450_v57 }
  0xe6   : > { %v420_v58 = vpop.f32.mrf.mxu2 }
  0xe7   : > { %v469_v59 = vpop.f32.mrf.mxu3 }
  0xe8   : > { %v784_v60 = vpop.eup %783  ;;  %v470_v61 = vadd.f32 %v469_v59, %v420_v58 }
  0xe9   : > { %502 = vst [vmem:[%s915_s24 + $0x70] sm:$0xff] %v784_v60 }
  0xea   : > { %v786_v62 = vpop.eup %785  ;;  %787 = vtanh.f32 %v470_v61 }
  0xeb   : > { %495 = vst [vmem:[%s915_s24 + $0x38] sm:$0xff] %v786_v62 }
  0xf0   : > { %v788_v63 = vpop.eup %787 }
  0xf1   : > { %503 = vst [vmem:[%s915_s24 + $0x78] sm:$0xff] %v788_v63 }
  0xf2 PF: > { %s12_s9 = sadd.s32 1, %s795_s9  }
  0xf3   : > { %p9_p4 = scmp.ge.s32.totalorder %s12_s9, 4  }
  0xf5   :  { %11 = sbr.rel (!%p9_p4) target bundleno = 1 (0x1), region = 58 }

</bundles_post_ra>
